<compile_context>
chip_gen: v7x
topology: tpu7x:2x2x1
jax: 0.10.0
libtpu: 0.0.40
codegen_flags: <defaults>
</compile_context>

<pallas_src>
import functools

import jax
import jax.numpy as jnp
from jax.experimental import pallas as pl
from jax.experimental.pallas import tpu as pltpu


def _round_up(x, m):
    return (x + m - 1) // m * m


def _pad_axis(x, axis, multiple):
    """Zero-pad `axis` of x up to the next multiple of `multiple`."""
    size = x.shape[axis]
    pad = _round_up(size, multiple) - size
    if pad == 0:
        return x
    widths = [(0, 0)] * x.ndim
    widths[axis] = (0, pad)
    return jnp.pad(x, widths)


def _vmem_limit_bytes():
    """Per-generation VMEM budget: ~48 MiB on v7x (64 MiB physical VMEM),
    ~96 MiB on v5e/v6e (128 MiB physical VMEM)."""
    cap = 64 << 20  # conservative default (v7x)
    try:
        info = pltpu.get_tpu_info()
        cap = int(getattr(info, "vmem_capacity_bytes", cap))
    except Exception:
        pass
    return min(cap * 3 // 4, 96 << 20)


def _pick_layer1_tiles(k, n_padded, m_nominal, vmem_limit):
    """(tk, tn) for the layer-1 weight-streaming matmul.

    tn: split the (256-padded) N into exactly 2 lane-dense 'parallel' tiles
        (one per TensorCore on v7x megacore).
    tk: largest K tile whose double-buffered working set fits under the VMEM
        budget -> few, large weight DMAs (grid-step overhead amortized).
    """
    tn = n_padded // 2 if n_padded >= 256 else n_padded
    budget = vmem_limit - (8 << 20)          # headroom for compiler scratch
    tk = 128
    for cand in (8192, 4096, 2048, 1024, 512, 256, 128):
        need = (2 * cand * tn * 2            # weight double buffer (bf16)
                + 2 * m_nominal * cand * 2   # activation double buffer (bf16)
                + m_nominal * tn * (2 + 4)   # resident bf16 out + f32 acc scratch
                + 2 * tn * 4)                # bias
        if need <= budget:
            tk = cand
            break
    kp128 = _round_up(k, 128)
    if kp128 <= tk:                          # small K: single reduction step
        tk = kp128
    return tk, tn


def _pick_layer2_tk(h1_padded):
    """Largest standard K tile dividing the padded h1 (h1_p is a 256 multiple)."""
    for cand in (2048, 1024, 512, 256):
        if h1_padded % cand == 0:
            return cand
    return h1_padded


# ---------------------------------------------------------------------------
# Kernel 1: y = relu(x @ W + b); big K reduction (innermost, "arbitrary"),
# N tiled ("parallel" -> megacore), f32 accumulation in a VMEM scratch,
# bf16 lane-dense output (halves a1's HBM traffic).
# ---------------------------------------------------------------------------
def _linear_relu_kernel(x_ref, w_ref, b_ref, o_ref, acc_ref, *, apply_relu):
    k = pl.program_id(1)

    @pl.when(k == 0)
    def _():
        acc_ref[...] = jnp.zeros_like(acc_ref)

    # bf16 x bf16 -> f32 accumulate (MXU native).
    acc_ref[...] += jnp.dot(
        x_ref[...], w_ref[...], preferred_element_type=jnp.float32
    )

    @pl.when(k == pl.num_programs(1) - 1)
    def _():
        y = acc_ref[...] + b_ref[...]
        if apply_relu:
            y = jnp.maximum(y, 0.0)
        o_ref[...] = y.astype(o_ref.dtype)


def pallas_linear_relu(x_bf16, w_t, b, *, tk, tn, vmem_limit, apply_relu=True):
    """x_bf16: (M, Kp) bf16, w_t: (Kp, N) bf16 (pre-transposed/padded at init),
    b: (N,) f32.  Kp % tk == 0 and N % tn == 0 (caller pads)."""
    M, Kp = x_bf16.shape
    Kp_w, N = w_t.shape
    assert Kp == Kp_w and Kp % tk == 0 and N % tn == 0

    kernel = functools.partial(_linear_relu_kernel, apply_relu=apply_relu)
    flops = 2 * M * Kp * N
    bytes_accessed = Kp * N * 2 + M * Kp * 2 + M * N * 2 + N * 4

    return pl.pallas_call(
        kernel,
        out_shape=jax.ShapeDtypeStruct((M, N), jnp.bfloat16),
        grid_spec=pltpu.PrefetchScalarGridSpec(
            num_scalar_prefetch=0,
            grid=(N // tn, Kp // tk),          # K reduction innermost / last
            in_specs=[
                pl.BlockSpec((M, tk), lambda n, k: (0, k)),    # activations
                # (optionally pipeline_mode=pl.Buffered(3) on v7x once profiled)
                pl.BlockSpec((tk, tn), lambda n, k: (k, n)),   # weights (K, N)
                pl.BlockSpec((1, tn), lambda n, k: (0, n)),    # bias
            ],
            out_specs=pl.BlockSpec((M, tn), lambda n, k: (0, n)),
            scratch_shapes=[pltpu.VMEM((M, tn), jnp.float32)], # f32 accumulator
        ),
        compiler_params=pltpu.CompilerParams(
            dimension_semantics=("parallel", "arbitrary"),
            vmem_limit_bytes=vmem_limit,
        ),
        cost_estimate=pl.CostEstimate(
            flops=flops, transcendentals=0, bytes_accessed=bytes_accessed
        ),
    )(x_bf16, w_t, b.reshape(1, N))


# ---------------------------------------------------------------------------
# Kernel 2: fused layers 2 + 3:
#   a2 = relu(a1 @ W2 + b2);  out = a2 @ W3 + b3
# K reduction over padded h1; a2 never leaves VMEM; a1 arrives as bf16.
# ---------------------------------------------------------------------------
def _mlp_head_kernel(x_ref, w2_ref, b2_ref, w3_ref, b3_ref, o_ref, acc_ref):
    k = pl.program_id(0)

    @pl.when(k == 0)
    def _():
        acc_ref[...] = jnp.zeros_like(acc_ref)

    acc_ref[...] += jnp.dot(
        x_ref[...], w2_ref[...], preferred_element_type=jnp.float32
    )

    @pl.when(k == pl.num_programs(0) - 1)
    def _():
        a2 = jnp.maximum(acc_ref[...] + b2_ref[...], 0.0)
        o_ref[...] = (
            jnp.dot(a2.astype(jnp.bfloat16), w3_ref[...],
                    preferred_element_type=jnp.float32)
            + b3_ref[...]
        )


def pallas_mlp_head(x_bf16, w2_t, b2, w3_t, b3, *, tk, vmem_limit):
    """x_bf16: (M, Kp) bf16, w2_t: (Kp, H2p) bf16, w3_t: (H2p, OUTp) bf16."""
    M, Kp = x_bf16.shape
    Kp_w, H2 = w2_t.shape
    H2_w, OUT = w3_t.shape
    assert Kp == Kp_w and H2 == H2_w and Kp % tk == 0

    return pl.pallas_call(
        _mlp_head_kernel,
        out_shape=jax.ShapeDtypeStruct((M, OUT), jnp.float32),
        grid_spec=pltpu.PrefetchScalarGridSpec(
            num_scalar_prefetch=0,
            grid=(Kp // tk,),
            in_specs=[
                pl.BlockSpec((M, tk), lambda k: (0, k)),      # a1 tile (bf16)
                pl.BlockSpec((tk, H2), lambda k: (k, 0)),     # W2 (K, H2p)
                pl.BlockSpec((1, H2), lambda k: (0, 0)),      # b2
                pl.BlockSpec((H2, OUT), lambda k: (0, 0)),    # W3 (H2p, OUTp)
                pl.BlockSpec((1, OUT), lambda k: (0, 0)),     # b3
            ],
            out_specs=pl.BlockSpec((M, OUT), lambda k: (0, 0)),
            scratch_shapes=[pltpu.VMEM((M, H2), jnp.float32)],
        ),
        compiler_params=pltpu.CompilerParams(
            dimension_semantics=("arbitrary",),
            vmem_limit_bytes=vmem_limit,
        ),
    )(x_bf16, w2_t, b2.reshape(1, H2), w3_t, b3.reshape(1, OUT))


# ---------------------------------------------------------------------------
# Module mirror
# ---------------------------------------------------------------------------
class VGGPallas:
    """Mirror of the PyTorch VGG module (3 Linear layers, ReLU between)."""

    def __init__(self, in_features, h1, h2, out_features, key, *, nominal_batch=8):
        k1, k2, k3, k4, k5, k6 = jax.random.split(key, 6)

        self.in_features = in_features
        self.h1, self.h2, self.out_features = h1, h2, out_features

        # Padded widths: h1 -> multiple of 256 (so tn = h1_p/2 is a 128
        # multiple and the "parallel" N axis has exactly 2 tiles), h2 / out ->
        # multiples of 128 (lane-dense, no masked stores). Padding columns are
        # zero weights + zero bias, so ReLU keeps them exactly zero end-to-end.
        self.h1_p = _round_up(h1, 256)
        self.h2_p = _round_up(h2, 128)
        self.out_p = _round_up(out_features, 128)

        # Generation-aware tiling (v7x 64 MiB VMEM vs v5e/v6e 128 MiB).
        self.vmem_limit = _vmem_limit_bytes()
        self.tk1, self.tn1 = _pick_layer1_tiles(
            in_features, self.h1_p, _round_up(nominal_batch, 8), self.vmem_limit)
        self.tk2 = _pick_layer2_tk(self.h1_p)

        def uniform_w(kw, fan_in, fan_out):
            # PyTorch nn.Linear default: U(-1/sqrt(fan_in), 1/sqrt(fan_in)),
            # generated DIRECTLY in (in, out) bf16 layout: no huge f32
            # transient, no transpose/cast pass at init.
            bound = 1.0 / float(fan_in) ** 0.5
            return jax.random.uniform(kw, (fan_in, fan_out), jnp.bfloat16,
                                      -bound, bound)

        def uniform_b(kb, fan_in, fan_out):
            bound = 1.0 / float(fan_in) ** 0.5
            return jax.random.uniform(kb, (fan_out,), jnp.float32, -bound, bound)

        # W1: (K, h1) -> pad K to the layer-1 K tile, N to h1_p.
        self.w1_t = _pad_axis(_pad_axis(uniform_w(k1, in_features, h1),
                                        0, self.tk1), 1, 256)
        self.b1 = _pad_axis(uniform_b(k2, in_features, h1), 0, 256)
        # W2: (h1, h2) -> pad K to h1_p (tk2 divides it), N to h2_p.
        self.w2_t = _pad_axis(_pad_axis(uniform_w(k3, h1, h2), 0, 256), 1, 128)
        self.b2 = _pad_axis(uniform_b(k4, h1, h2), 0, 128)
        # W3: (h2, out) -> pad K to h2_p, N to out_p.
        self.w3_t = _pad_axis(_pad_axis(uniform_w(k5, h2, out_features),
                                        0, 128), 1, 128)
        self.b3 = _pad_axis(uniform_b(k6, h2, out_features), 0, 128)

    def __call__(self, img):
        B = img.shape[0]
        # glue: flatten NCHW -> (batch, C*H*W), pad batch to a multiple of 8,
        # pad K to the layer-1 K tile, cast activations to bf16 for the MXU.
        x = img.reshape(B, -1)
        x = _pad_axis(_pad_axis(x, 0, 8), 1, self.tk1).astype(jnp.bfloat16)

        a1 = pallas_linear_relu(
            x, self.w1_t, self.b1, tk=self.tk1, tn=self.tn1,
            vmem_limit=self.vmem_limit, apply_relu=True)       # (Mp, h1_p) bf16

        out = pallas_mlp_head(
            a1, self.w2_t, self.b2, self.w3_t, self.b3,
            tk=self.tk2, vmem_limit=self.vmem_limit)           # (Mp, out_p) f32
        return out[:B, :self.out_features]


if __name__ == "__main__":
    # Small shapes consistent with the module structure:
    #   batch=8, image (3, 16, 16) -> in_features = 768, h1=256, h2=128, out=2
    B, C, H, W = 8, 3, 16, 16
    IN, H1, H2, OUT = C * H * W, 256, 128, 2

    key = jax.random.PRNGKey(0)
    k_img, k_params = jax.random.split(key)
    img = jax.random.normal(k_img, (B, C, H, W), dtype=jnp.float32)

    model = VGGPallas(IN, H1, H2, OUT, k_params)
    out = jax.block_until_ready(model(img))
    assert out.shape == (B, OUT)

    # pure-JAX reference using the same bf16 weights / roundings the kernels see
    xb = img.reshape(B, -1).astype(jnp.bfloat16).astype(jnp.float32)
    w1 = model.w1_t[:IN, :H1].astype(jnp.float32)
    w2 = model.w2_t[:H1, :H2].astype(jnp.float32)
    w3 = model.w3_t[:H2, :OUT].astype(jnp.float32)
    b1, b2, b3 = model.b1[:H1], model.b2[:H2], model.b3[:OUT]
    a1 = jnp.maximum(xb @ w1 + b1, 0.0).astype(jnp.bfloat16).astype(jnp.float32)
    a2 = jnp.maximum(a1 @ w2 + b2, 0.0).astype(jnp.bfloat16).astype(jnp.float32)
    ref = a2 @ w3 + b3

    err = float(jnp.max(jnp.abs(out - ref)))
    assert jnp.allclose(out, ref, atol=3e-2, rtol=3e-2), f"max abs err {err}"

    print("KERNEL_OK")
</pallas_src>

<mosaic_0001>
module attributes {stable_mosaic.version = 11 : i64} {
  func.func @_linear_relu_kernel(%arg0: i32, %arg1: i32, %arg2: memref<8x768xbf16, #tpu.memory_space<vmem>>, %arg3: memref<768x128xbf16, #tpu.memory_space<vmem>>, %arg4: memref<1x128xf32, #tpu.memory_space<vmem>>, %arg5: memref<8x128xbf16, #tpu.memory_space<vmem>>, %arg6: memref<8x128xf32, #tpu.memory_space<vmem>>) attributes {dimension_semantics = [#tpu.dimension_semantics<parallel>, #tpu.dimension_semantics<arbitrary>], iteration_bounds = array<i64: 2, 1>, scalar_prefetch = 0 : i64, scratch_operands = 1 : i64, tpu.core_type = #tpu.core_type<tc>, window_params = [{transform_indices = @transform_0, window_bounds = array<i64: 8, 768>}, {transform_indices = @transform_1, window_bounds = array<i64: 768, 128>}, {transform_indices = @transform_2, window_bounds = array<i64: 1, 128>}, {transform_indices = @transform_3, window_bounds = array<i64: 8, 128>}]} {
    %c0_i32 = arith.constant 0 : i32
    %0 = arith.cmpi eq, %arg1, %c0_i32 : i32
    %1 = arith.extui %0 : i1 to i32
    %c0_i32_0 = arith.constant 0 : i32
    %2 = arith.cmpi ne, %1, %c0_i32_0 : i32
    scf.if %2 {
      %cst_10 = arith.constant 0.000000e+00 : f32
      %12 = vector.broadcast %cst_10 : f32 to vector<8x128xf32>
      %c0_11 = arith.constant 0 : index
      %c0_12 = arith.constant 0 : index
      %13 = vector.load %arg6[%c0_11, %c0_12] : memref<8x128xf32, #tpu.memory_space<vmem>>, vector<8x128xf32>
      tpu.vector_store %arg6[%c0_11, %c0_12], %12 {strides = array<i32>} : memref<8x128xf32, #tpu.memory_space<vmem>>, vector<8x128xf32>,
    } else {
    }
    %c0 = arith.constant 0 : index
    %c0_1 = arith.constant 0 : index
    %3 = vector.load %arg6[%c0, %c0_1] : memref<8x128xf32, #tpu.memory_space<vmem>>, vector<8x128xf32>
    %c0_2 = arith.constant 0 : index
    %c0_3 = arith.constant 0 : index
    %4 = vector.load %arg2[%c0_2, %c0_3] : memref<8x768xbf16, #tpu.memory_space<vmem>>, vector<8x768xbf16>
    %c0_4 = arith.constant 0 : index
    %c0_5 = arith.constant 0 : index
    %5 = vector.load %arg3[%c0_4, %c0_5] : memref<768x128xbf16, #tpu.memory_space<vmem>>, vector<768x128xbf16>
    %cst = arith.constant dense<0.000000e+00> : vector<8x128xf32>
    %6 = tpu.matmul %4, %5, %cst {dimension_numbers = #tpu.dot_dimension_numbers<[1], [0], [0], [1], [0, 0, 1, 1], [], []>} : vector<8x768xbf16>, vector<768x128xbf16>, vector<8x128xf32> -> vector<8x128xf32>
    %7 = arith.addf %3, %6 : vector<8x128xf32>
    %c0_6 = arith.constant 0 : index
    %c0_7 = arith.constant 0 : index
    %8 = vector.load %arg6[%c0_6, %c0_7] : memref<8x128xf32, #tpu.memory_space<vmem>>, vector<8x128xf32>
    tpu.vector_store %arg6[%c0_6, %c0_7], %7 {strides = array<i32>} : memref<8x128xf32, #tpu.memory_space<vmem>>, vector<8x128xf32>,
    %c0_i32_8 = arith.constant 0 : i32
    %9 = arith.cmpi eq, %arg1, %c0_i32_8 : i32
    %10 = arith.extui %9 : i1 to i32
    %c0_i32_9 = arith.constant 0 : i32
    %11 = arith.cmpi ne, %10, %c0_i32_9 : i32
    scf.if %11 {
      %c0_10 = arith.constant 0 : index
      %c0_11 = arith.constant 0 : index
      %12 = vector.load %arg6[%c0_10, %c0_11] : memref<8x128xf32, #tpu.memory_space<vmem>>, vector<8x128xf32>
      %c0_12 = arith.constant 0 : index
      %c0_13 = arith.constant 0 : index
      %13 = vector.load %arg4[%c0_12, %c0_13] : memref<1x128xf32, #tpu.memory_space<vmem>>, vector<1x128xf32>
      %14 = vector.broadcast %13 : vector<1x128xf32> to vector<8x128xf32>
      %15 = arith.addf %12, %14 : vector<8x128xf32>
      %cst_14 = arith.constant 0.000000e+00 : f32
      %16 = vector.broadcast %cst_14 : f32 to vector<8x128xf32>
      %17 = arith.maximumf %15, %16 : vector<8x128xf32>
      %18 = arith.truncf %17 : vector<8x128xf32> to vector<8x128xbf16>
      %c0_15 = arith.constant 0 : index
      %c0_16 = arith.constant 0 : index
      %19 = vector.load %arg5[%c0_15, %c0_16] : memref<8x128xbf16, #tpu.memory_space<vmem>>, vector<8x128xbf16>
      tpu.vector_store %arg5[%c0_15, %c0_16], %18 {strides = array<i32>} : memref<8x128xbf16, #tpu.memory_space<vmem>>, vector<8x128xbf16>,
    } else {
    }
    return
  }
  func.func @transform_0(%arg0: i32, %arg1: i32) -> (i32, i32) {
    %c0_i32 = arith.constant 0 : i32
    %c0_i32_0 = arith.constant 0 : i32
    return %c0_i32, %arg1 : i32, i32
  }
  func.func @transform_1(%arg0: i32, %arg1: i32) -> (i32, i32) {
    %c0_i32 = arith.constant 0 : i32
    return %arg1, %arg0 : i32, i32
  }
  func.func @transform_2(%arg0: i32, %arg1: i32) -> (i32, i32) {
    %c0_i32 = arith.constant 0 : i32
    %c0_i32_0 = arith.constant 0 : i32
    return %c0_i32, %arg0 : i32, i32
  }
  func.func @transform_3(%arg0: i32, %arg1: i32) -> (i32, i32) {
    %c0_i32 = arith.constant 0 : i32
    %c0_i32_0 = arith.constant 0 : i32
    return %c0_i32, %arg0 : i32, i32
  }
}

</mosaic_0001>

<bundles_post_ra>
// kernel: tpu_custom_call.1
= control target key start
LH: loop header
LB: loop body
LE: loop exit
PB: predicated region body
PF: predicated region fallthrough
CT: control target
= control target key end

     0   :  { %8 = vsyncpa [#allocation4], 0  ;;  %s1624_s0 = inlined_call_operand.hbm [shape: bf16[8,768], index: 0, kind: input, shape index: {}]   ;;  %s1625_s1 = inlined_call_operand.hbm [shape: bf16[768,256], index: 1, kind: input, shape index: {}]   ;;  %s1626_s2 = inlined_call_operand.vmem [shape: f32[1,256], index: 2, kind: input, shape index: {}]   ;;  %s1627_s3 = inlined_call_operand.hbm [shape: bf16[8,256], index: 3, kind: output, shape index: {}]  }
   0x1   :  { %9 = vsyncpa [#allocation7], 0 }
   0x2   :  { %11 = vsyncpa [#allocation7 + $0x1], 0 }
   0x3   :  { %12 = vsyncpa [#allocation5], 0 }
   0x4   :  { %14 = vsyncpa [#allocation5 + $0x1], 0  ;;  %s1349_s12 = smov 0   ;;  %s1351_s13 = smov 0  }
   0x5   :  { %s1353_s14 = smov 0   ;;  %s1355_s15 = smov 0  }
   0x6   :  { %s1357_s16 = smov 0   ;;  %s1359_s17 = smov 0  }
   0x7 LB: > { %s911_s18 = sadd.s32 4294967295, %s1321_s17   ;;  %s912_s19 = sadd.s32 4294967294, %s1321_s17   ;;  %s1321_s17 = sphi %s1359_s17, %s20_s17   ;;  %s1317_s16 = sphi %s1357_s16, %s1655_s16   ;;  %s1313_s15 = sphi %s1355_s15, %s1654_s15   ;;  %s1309_s14 = sphi %s1353_s14, %s1653_s14   ;;  %s1305_s13 = sphi %s1351_s13, %s1652_s13   ;;  %s1301_s12 = sphi %s1349_s12, %s1651_s12  }
   0x8   : > { %s67_s20 = sadd.s32 1, %s1309_s14  ;;  %p74_p0 = scmp.ne.s32.totalorder %s1309_s14, %s1305_s13 }
   0x9   : > { %p75_p1 = scmp.eq.s32.totalorder %s1321_s17, 0  ;;  %p80_p2 = scmp.ne.s32.totalorder %s1305_s13, %s1301_s12 }
   0xa   : > { %p1387_p3 = scmp.eq.s32.totalorder %s911_s18, 0  ;;  %p130_p4 = scmp.eq.s32.totalorder %s911_s18, 1 }
   0xb   : > { %p1391_p5 = por %p75_p1, %p74_p0  ;;  %p136_p6 = scmp.eq.s32.totalorder %s912_s19, 1 }
   0xc   : > { %s1634_s21 = scalar_select %p1387_p3, 1, 0 }
   0xd   : > { %p1397_p7 = por %p1387_p3, %p80_p2  ;;  %p1401_p8 = por %p130_p4, %p74_p0 }
   0xe   : > { %p1405_p9 = por %p136_p6, %p80_p2  ;;  %p913_p10 = scmp.ge.s32.totalorder %s1321_s17, 1 }
   0xf   : > { %s1636_s23 = scalar_select %p1397_p7, 1, 0 }
  0x10   : > { %s1637_s24 = scalar_select %p1401_p8, 1, 0 }
  0x11   : > { %s1638_s25 = scalar_select %p1405_p9, 1, 0 }
  0x12   : > { %p143_p11 = scmp.lt.s32.totalorder %s1321_s17, 3  ;;  %s1323_s27 = smov [#allocation3]  }
  0x13   : > { %s159_s28 = sshll.u32 %s1323_s27, 4  ;;  %p1068_p1 = scmp.lt.s32.totalorder %s1321_s17, 2  ;;  %s160_s28 = int_to_ptr.vmem [resolvable:$true] %s159_s28 }
  0x14   : > { %p1412_p13 = pnand %p913_p10, %p143_p11  ;;  %s32_s4 = sadd.s32 1, %s1317_s16 }
  0x15   : > { %p1421_p4 = pnand %p1068_p1, %p1391_p5  ;;  %p1432_p6 = scmp.ge.s32.totalorder %s32_s4, 2 }
  0x16   : > { %s1639_s26 = scalar_select %p1412_p13, 1, 0 }
  0x17   : > { %p1055_p0 = pneg %p1412_p13  ;;  %s170_s6 = sand.u32 1, %s1309_s14  }
  0x18   : > { %s1640_s29 = scalar_select %p1421_p4, 1, 0 }
  0x19   : > { %p1427_p2 = pnand %p1055_p0, %p1387_p3  ;;  %s1177_s9 = scalar_lea.hbm %s1624_s0, 384 }
  0x1a   : > { %s1642_s5 = scalar_select %p1432_p6, 1, 0 }
  0x1b   : > { %p1178_p5 = scmp.ne.s32.totalorder %s1624_s0, %s1177_s9  ;;  %p1179_p10 = pneg %p1427_p2 }
  0x1c   : > { %p1184_p0 = scmp.lt.u32.totalorder %s1177_s9, %s1624_s0 }
  0x1d   : > { %p1180_p11 = pnand %p1179_p10, %p1178_p5 }
  0x1f   : > { %p1181_p1 = pneg %p1180_p11 }
  0x21   : > { %p1186_p12 = pnand %p1184_p0, %p1181_p1 }
  0x23   : > { %1189 = shalt.err (!%p1186_p12)
}
  0x24   : > { %s1190_s22 = scalar_lea.vmem %s160_s28, 384  ;;  %p1198_p3 = scmp.lt.s32.totalorder %s160_s28, %s160_s28 }
  0x25   : > { %p1191_p9 = scmp.ne.s32.totalorder %s160_s28, %s1190_s22  ;;  %p1199_p13 = scmp.lt.s32.totalorder %s1190_s22, %s1190_s22 }
  0x27   : > { %p1193_p8 = pnand %p1191_p9, %p1179_p10  ;;  %p1200_p4 = por %p1199_p13, %p1198_p3 }
  0x29   : > { %p1194_p7 = pneg %p1193_p8 }
  0x2b   : > { %p1201_p6 = pnand %p1200_p4, %p1194_p7 }
  0x2d   : > { %1204 = shalt.err (!%p1201_p6)
}
  0x2e   : > { %1058 = dma.hbm_to_vmem [thread:$0]  (!%p1427_p2), %s1624_s0, 384, %s160_s28, [#allocation4]  }
  0x2f   : > { %p1643_p9 = scmp.ne.s32.totalorder %s1642_s5, 0  ;;  %s1045_s8 = smul.u32 384, %s170_s6 }
  0x30   : > { %s916_s10 = sshll.u32 %s1317_s16, 6  ;;  %s1472_s5 = scalar_lea.sflag [#allocation7], %s170_s6 }
  0x31   : > { %s1657_s4 = smov (%p1643_p9, %s32_s4), 0  ;;  %s1463_s18 = scalar_lea.hbm %s1625_s1, %s916_s10 }
  0x32   : > { %s63_s9 = ssub.s32 %s1317_s16, %s1657_s4  ;;  %s174_s19 = scalar_lea.vmem [#allocation6], %s1045_s8 }
  0x33   : > { %p65_p3 = scmp.eq.s32.totalorder %s63_s9, 0  ;;  %s183_s22 = sshll.u32 %s174_s19, 4  ;;  %s1470_s22 = int_to_ptr.vmem [resolvable:$true] %s183_s22 }
  0x34   : > { %s1205_s27 = scalar_lea.hbm %s1463_s18, 6144  ;;  %p1644_p8 = scmp.ne.s32.totalorder %s1640_s29, 0 }
  0x35   : > { %s1468_s28 = scalar_select %p65_p3, %s1309_s14, %s67_s20  }
  0x36   : > { %p1206_p7 = scmp.ne.s32.totalorder %s1463_s18, %s1205_s27  ;;  %p1207_p12 = pneg %p1644_p8 }
  0x37   : > { %s1210_s8 = scalar_lea.hbm %s1625_s1, 12288  ;;  %p1211_p2 = scmp.lt.u32.totalorder %s1463_s18, %s1625_s1 }
  0x38   : > { %p1208_p13 = pnand %p1207_p12, %p1206_p7  ;;  %p1212_p6 = scmp.lt.u32.totalorder %s1210_s8, %s1205_s27 }
  0x39   : > { %p1214_p10 = scmp.lt.u32.totalorder %s1205_s27, %s1463_s18 }
  0x3a   : > { %p1209_p4 = pneg %p1208_p13  ;;  %p1213_p5 = por %p1212_p6, %p1211_p2 }
  0x3c   : > { %p1215_p11 = por %p1214_p10, %p1213_p5 }
  0x3e   : > { %p1216_p1 = pnand %p1215_p11, %p1209_p4 }
  0x40   : > { %1219 = shalt.err (!%p1216_p1)
}
  0x41   : > { %s1220_s20 = scalar_lea.vmem %s1470_s22, 6144  ;;  %s1324_s6 = smov [#allocation6]  }
  0x42   : > { %p1221_p0 = scmp.ne.s32.totalorder %s1470_s22, %s1220_s20  ;;  %s1225_s11 = sshll.u32 %s1324_s6, 4  ;;  %s1226_s11 = int_to_ptr.vmem [resolvable:$false] %s1225_s11 }
  0x43   : > { %s1227_s19 = scalar_lea.vmem %s1226_s11, 12288  ;;  %p1228_p7 = scmp.lt.s32.totalorder %s1470_s22, %s1226_s11 }
  0x44   : > { %p1223_p9 = pnand %p1221_p0, %p1207_p12  ;;  %p1229_p13 = scmp.lt.s32.totalorder %s1227_s19, %s1220_s20 }
  0x46   : > { %p1224_p3 = pneg %p1223_p9  ;;  %p1230_p2 = por %p1229_p13, %p1228_p7 }
  0x48   : > { %p1231_p6 = pnand %p1230_p2, %p1224_p3 }
  0x4a   : > { %1234 = shalt.err (!%p1231_p6)
}
  0x4b   : > { %s1325_s27 = smov 128   ;;  %s1326_s7 = smov 64  }
  0x4c   : > { %s1327_s9 = smov 4   ;;  %p1645_p12 = scmp.ne.s32.totalorder %s1639_s26, 0 }
  0x4d   : > { %1062 = dma.hbm_to_vmem [thread:$0]  (!%p1644_p8), %s1463_s18, 6144, %s1470_s22, %s1472_s5, %s1325_s27, %s1326_s7, %s1327_s9  }
  0x4e   : > { %201 = sbr.rel (%p1645_p12) target bundleno = 394 (0x18a), region = 32  ;;  %p1646_p4 = scmp.ne.s32.totalorder (!%p1645_p12), %s1634_s21, 0 }
  0x55   : > { %1288 = dma.done.wait (%p1646_p4), [#allocation4], 384  }
  0x56   : > { %1290 = vsyncadd (%p1646_p4), [#allocation4], 4294966912  ;;  %s1507_s8 = sand.u32 1, %s1305_s13   ;;  %p1647_p8 = scmp.ne.s32.totalorder %s1636_s23, 0 }
  0x57   : > { %s1046_s10 = smul.u32 384, %s1507_s8  ;;  %s208_s30 = scalar_lea.sflag [#allocation7], %s1507_s8 }
  0x59   : > { %s1511_s20 = scalar_lea.vmem [#allocation6], %s1046_s10 }
  0x5a   : > { %1292 = dma.done.wait (%p1647_p8), %s208_s30, 6144  }
  0x5b   : > { %1294 = vsyncadd (%p1647_p8), %s208_s30, 4294961152  ;;  %v1123_v0 = vld [vmem:[%s1511_s20 + $0x40] sm:$0xff]   ;;  %v1127_v4 = vld [vmem:[%s1511_s20 + $0x48] sm:$0xff]   ;;  %p239_p5 = scmp.lt.s32.totalorder %s1313_s15, 1  ;;  %s919_s18 = sshll.u32 %s1507_s8, 2 }
  0x5c   : > { %v1124_v1 = vld [vmem:[%s1511_s20 + $0xc0] sm:$0xff]   ;;  %979 = vmatprep.subr.bf16.mxu0 %v1123_v0  ;;  %v1128_v5 = vld [vmem:[%s1511_s20 + $0xc8] sm:$0xff]   ;;  %v1131_v8 = vld [vmem:[%s1511_s20 + $0x50] sm:$0xff]   ;;  %s976_s22 = sshll.u32 %s1313_s15, 6  ;;  %s236_s5 = scalar_lea.vmem [#allocation8], %s919_s18 }
  0x5d   : > { %v1125_v2 = vld [vmem:[%s1511_s20] sm:$0xff]   ;;  %1001 = vmatprep.subr.bf16.mxu1 %v1124_v1  ;;  %v1129_v6 = vld [vmem:[%s1511_s20 + $0x8] sm:$0xff]   ;;  %v1132_v9 = vld [vmem:[%s1511_s20 + $0xd0] sm:$0xff]   ;;  %s240_s21 = scalar_select %p239_p5, %s1313_s15, 1 }
  0x5e   : > { %v1126_v3 = vld [vmem:[%s1511_s20 + $0x80] sm:$0xff]   ;;  %980 = vmatpush3.bf16.msra.mxu0 %v1125_v2  ;;  %v1130_v7 = vld [vmem:[%s1511_s20 + $0x88] sm:$0xff]   ;;  %v1133_v10 = vld [vmem:[%s1511_s20 + $0x10] sm:$0xff]   ;;  %s808_s6 = sshll.u32 %s236_s5, 4  ;;  %s1575_s27 = scalar_lea.hbm %s1627_s3, %s976_s22  ;;  %s1577_s6 = int_to_ptr.vmem [resolvable:$true] %s808_s6 }
  0x5f   : > { %1002 = vmatpush3.bf16.msra.mxu1 %v1126_v3  ;;  %981 = vmatprep.subr.bf16.mxu0 %v1127_v4  ;;  %v1134_v11 = vld [vmem:[%s1511_s20 + $0x90] sm:$0xff]   ;;  %v1135_v12 = vld [vmem:[%s1511_s20 + $0x58] sm:$0xff]   ;;  %v1139_v16 = vld [vmem:[%s1511_s20 + $0x60] sm:$0xff]   ;;  %s241_s29 = scalar_lea.vmem %s1626_s2, %s240_s21  ;;  %s795_s7 = scalar_lea.sflag [#allocation5], %s1507_s8 }
  0x60   : > { %1003 = vmatprep.subr.bf16.mxu1 %v1128_v5  ;;  %v1136_v13 = vld [vmem:[%s1511_s20 + $0xd8] sm:$0xff]   ;;  %v1140_v17 = vld [vmem:[%s1511_s20 + $0xe0] sm:$0xff]   ;;  %v1143_v20 = vld [vmem:[%s1511_s20 + $0x68] sm:$0xff]   ;;  %s1235_s9 = scalar_lea.vmem %s1577_s6, 64  ;;  %p1648_p11 = scmp.ne.s32.totalorder %s1637_s24, 0 }
  0x61   : > { %v1137_v14 = vld [vmem:[%s1511_s20 + $0x18] sm:$0xff]   ;;  %v1141_v18 = vld [vmem:[%s1511_s20 + $0x20] sm:$0xff]   ;;  %v1144_v21 = vld [vmem:[%s1511_s20 + $0xe8] sm:$0xff]   ;;  %p1236_p10 = scmp.ne.s32.totalorder %s1577_s6, %s1235_s9  ;;  %s1328_s15 = smov [#allocation8]  }
  0x62   : > { %982 = vmatpush3.bf16.msra.mxu0 %v1129_v6  ;;  %v1138_v15 = vld [vmem:[%s1511_s20 + $0x98] sm:$0xff]   ;;  %v1142_v19 = vld [vmem:[%s1511_s20 + $0xa0] sm:$0xff]   ;;  %v1145_v22 = vld [vmem:[%s1511_s20 + $0x28] sm:$0xff]   ;;  %s1239_s10 = sshll.u32 %s1328_s15, 4  ;;  %s1240_s10 = int_to_ptr.vmem [resolvable:$false] %s1239_s10 }
  0x63   : > { %1004 = vmatpush3.bf16.msra.mxu1 %v1130_v7  ;;  %983 = vmatprep.subr.bf16.mxu0 %v1131_v8  ;;  %v1146_v23 = vld [vmem:[%s1511_s20 + $0xa8] sm:$0xff]   ;;  %v1147_v24 = vld [vmem:[%s1511_s20 + $0x70] sm:$0xff]   ;;  %v1151_v28 = vld [vmem:[%s1511_s20 + $0x78] sm:$0xff]   ;;  %p1237_p1 = pnand %p1236_p10, %p1648_p11  ;;  %s1241_s30 = scalar_lea.vmem %s1240_s10, 128 }
  0x64   : > { %1005 = vmatprep.subr.bf16.mxu1 %v1132_v9  ;;  %v1148_v25 = vld [vmem:[%s1511_s20 + $0xf0] sm:$0xff]   ;;  %v1152_v29 = vld [vmem:[%s1511_s20 + $0xf8] sm:$0xff]   ;;  %v249_v32 = vld [vmem:[#allocation3] sm:$0xff]  ;;  %p1242_p9 = scmp.lt.s32.totalorder %s1577_s6, %s1240_s10  ;;  %p1243_p3 = scmp.lt.s32.totalorder %s1241_s30, %s1235_s9 }
  0x65   : > { %v1149_v26 = vld [vmem:[%s1511_s20 + $0x30] sm:$0xff]   ;;  %v1153_v30 = vld [vmem:[%s1511_s20 + $0x38] sm:$0xff]   ;;  %v920_v34 = vcombine.low %v249_v32, %v249_v32  ;;  %v921_v35 = vcombine.high %v249_v32, %v249_v32  ;;  %v1159_v38 = vld [vmem:[%s1511_s20 + $0x140] sm:$0xff]   ;;  %p1238_p0 = pneg %p1237_p1 }
  0x66   : > { %984 = vmatpush3.bf16.msra.mxu0 %v1133_v10  ;;  %v1150_v27 = vld [vmem:[%s1511_s20 + $0xb0] sm:$0xff]   ;;  %v1154_v31 = vld [vmem:[%s1511_s20 + $0xb8] sm:$0xff]   ;;  %v1160_v39 = vld [vmem:[%s1511_s20 + $0x100] sm:$0xff]   ;;  %p1244_p7 = por %p1243_p3, %p1242_p9 }
  0x67   : > { %1006 = vmatpush3.bf16.msra.mxu1 %v1134_v11  ;;  %985 = vmatprep.subr.bf16.mxu0 %v1135_v12  ;;  %v250_v33 = vld [vmem:[#allocation3 + $0x8] sm:$0xff]  ;;  %v1161_v40 = vld [vmem:[%s1511_s20 + $0x148] sm:$0xff]   ;;  %v1165_v44 = vld [vmem:[%s1511_s20 + $0x158] sm:$0xff]  }
  0x68   : > { %1007 = vmatprep.subr.bf16.mxu1 %v1136_v13  ;;  %v922_v36 = vcombine.low %v250_v33, %v250_v33  ;;  %v923_v37 = vcombine.high %v250_v33, %v250_v33  ;;  %689 = vmatprep.mubr.bf16.mxu0 %v921_v35  ;;  %v1162_v41 = vld [vmem:[%s1511_s20 + $0x108] sm:$0xff]   ;;  %v1163_v42 = vld [vmem:[%s1511_s20 + $0x150] sm:$0xff]   ;;  %v1166_v45 = vld [vmem:[%s1511_s20 + $0x118] sm:$0xff]   ;;  %p1245_p13 = pnand %p1244_p7, %p1238_p0 }
  0x69   : > { %v1164_v43 = vld [vmem:[%s1511_s20 + $0x110] sm:$0xff]   ;;  %v1167_v46 = vld [vmem:[%s1511_s20 + $0x160] sm:$0xff]   ;;  %v251_v47 = vld [vmem:[#allocation3 + $0x10] sm:$0xff] }
  0x6a   : > { %986 = vmatpush3.bf16.msra.mxu0 %v1137_v14  ;;  %729 = vmatprep.mubr.bf16.mxu1 %v923_v37  ;;  %v925_v48 = vcombine.high %v251_v47, %v251_v47  ;;  %v1168_v49 = vld [vmem:[%s1511_s20 + $0x120] sm:$0xff]   ;;  %v1169_v50 = vld [vmem:[%s1511_s20 + $0x168] sm:$0xff]   ;;  %v1171_v52 = vld [vmem:[%s1511_s20 + $0x170] sm:$0xff]   ;;  %v924_v56 = vcombine.low %v251_v47, %v251_v47 }
  0x6b   : > { %1008 = vmatpush3.bf16.msra.mxu1 %v1138_v15  ;;  %987 = vmatprep.subr.bf16.mxu0 %v1139_v16  ;;  %v1170_v51 = vld [vmem:[%s1511_s20 + $0x128] sm:$0xff]   ;;  %v1172_v53 = vld [vmem:[%s1511_s20 + $0x130] sm:$0xff]   ;;  %v1173_v54 = vld [vmem:[%s1511_s20 + $0x178] sm:$0xff]  }
  0x6c   : > { %1009 = vmatprep.subr.bf16.mxu1 %v1140_v17  ;;  %v1174_v55 = vld [vmem:[%s1511_s20 + $0x138] sm:$0xff]   ;;  %v974_v8 = vld [vmem:[%s241_s29] ss:$0 sm:$0xff] }
  0x6e   : > { %988 = vmatpush3.bf16.msra.mxu0 %v1141_v18 }
  0x6f   : > { %1010 = vmatpush3.bf16.msra.mxu1 %v1142_v19  ;;  %989 = vmatprep.subr.bf16.mxu0 %v1143_v20 }
  0x70   : > { %1011 = vmatprep.subr.bf16.mxu1 %v1144_v21 }
  0x72   : > { %990 = vmatpush3.bf16.msra.mxu0 %v1145_v22 }
  0x73   : > { %1012 = vmatpush3.bf16.msra.mxu1 %v1146_v23  ;;  %991 = vmatprep.subr.bf16.mxu0 %v1147_v24 }
  0x74   : > { %1013 = vmatprep.subr.bf16.mxu1 %v1148_v25 }
  0x76   : > { %992 = vmatpush3.bf16.msra.mxu0 %v1149_v26 }
  0x77   : > { %1014 = vmatpush3.bf16.msra.mxu1 %v1150_v27  ;;  %993 = vmatprep.subr.bf16.mxu0 %v1151_v28 }
  0x78   : > { %1015 = vmatprep.subr.bf16.mxu1 %v1152_v29 }
  0x7a   : > { %994 = vmatpush3.bf16.msra.mxu0 %v1153_v30 }
  0x7b   : > { %1016 = vmatpush3.bf16.msra.mxu1 %v1154_v31  ;;  %1023 = vmatprep.subr.bf16.mxu0 %v1159_v38 }
  0x7d   : > { %690 = vmatmul.mubr.bf16.vlgmr.msra.gmra.mrb[0].mxu0 %v920_v34 }
  0x7e   : > { %730 = vmatmul.mubr.bf16.vlgmr.msra.gmra.mrb[0].mxu1 %v922_v36  ;;  %1024 = vmatpush3.bf16.msra.mxu0 %v1160_v39 }
  0x7f   : > { %1025 = vmatprep.subr.bf16.mxu0 %v1161_v40  ;;  %769 = vmatprep.mubr.bf16.mxu0 %v925_v48 }
  0x82   : > { %1026 = vmatpush3.bf16.msra.mxu0 %v1162_v41 }
  0x83   : > { %1027 = vmatprep.subr.bf16.mxu0 %v1163_v42 }
  0x86   : > { %1028 = vmatpush3.bf16.msra.mxu0 %v1164_v43 }
  0x87   : > { %1029 = vmatprep.subr.bf16.mxu0 %v1165_v44 }
  0x8a   : > { %1030 = vmatpush3.bf16.msra.mxu0 %v1166_v45 }
  0x8b   : > { %1031 = vmatprep.subr.bf16.mxu0 %v1167_v46 }
  0x8e   : > { %1032 = vmatpush3.bf16.msra.mxu0 %v1168_v49 }
  0x8f   : > { %1033 = vmatprep.subr.bf16.mxu0 %v1169_v50 }
  0x92   : > { %1034 = vmatpush3.bf16.msra.mxu0 %v1170_v51 }
  0x93   : > { %1035 = vmatprep.subr.bf16.mxu0 %v1171_v52 }
  0x96   : > { %1036 = vmatpush3.bf16.msra.mxu0 %v1172_v53 }
  0x97   : > { %1037 = vmatprep.subr.bf16.mxu0 %v1173_v54 }
  0x9a   : > { %1038 = vmatpush3.bf16.msra.mxu0 %v1174_v55 }
  0x9d   : > { %770 = vmatmul.mubr.bf16.vlgmr.msra.gmra.mrb[4].mxu0 %v924_v56 }
 0x150   : > { %v995_v57 = vpop.f32.mrb[0].mxu0 }
 0x151   : > { %v1017_v58 = vpop.f32.mrb[0].mxu1  ;;  %v996_v59 = vpop.f32.mrb[1].mxu0 }
 0x152   : > { %v1018_v60 = vpop.f32.mrb[1].mxu1  ;;  %v997_v61 = vadd.f32 %v996_v59, %v995_v57  ;;  %v998_v63 = vpop.f32.mrb[2].mxu0 }
 0x153   : > { %v1019_v62 = vadd.f32 %v1018_v60, %v1017_v58  ;;  %v1020_v0 = vpop.f32.mrb[2].mxu1  ;;  %v999_v1 = vpop.f32.mrb[3].mxu0 }
 0x154   : > { %v1021_v2 = vpop.f32.mrb[3].mxu1 }
 0x155   : > { %v732_v3 = vadd.f32 %v1019_v62, %v997_v61 }
 0x170   : > { %v1039_v4 = vpop.f32.mrb[4].mxu0 }
 0x171   : > { %v1040_v5 = vpop.f32.mrb[5].mxu0 }
 0x172   : > { %v1041_v6 = vadd.f32 %v1040_v5, %v1039_v4  ;;  %v1042_v7 = vpop.f32.mrb[6].mxu0 }
 0x173   : > { %v1043_v9 = vpop.f32.mrb[7].mxu0 }
 0x174   : > { %v772_v10 = vadd.f32 %v1041_v6, %v732_v3 }
 0x176   : > { %v790_v11 = vadd.f32 %v974_v8, %v772_v10 }
 0x178   : > { %v791_v12 = vmax.f32 %v790_v11, 0.0 }
 0x17a   : > { %v792_v13 = vpack.c.bf16 %v791_v12, %v791_v12 }
 0x17c   : > { %793 = vst [vmem:[%s236_s5] sm:$0xf] %v792_v13 }
 0x17d   : > { %1248 = shalt.err (!%p1245_p13)
}
 0x17e   : > { %s1249_s8 = scalar_lea.hbm %s1575_s27, 64  ;;  %s1253_s23 = scalar_lea.hbm %s1627_s3, 128 }
 0x17f   : > { %p1250_p2 = scmp.ne.s32.totalorder %s1575_s27, %s1249_s8  ;;  %p1254_p4 = scmp.lt.u32.totalorder %s1575_s27, %s1627_s3 }
 0x180   : > { %p1255_p8 = scmp.lt.u32.totalorder %s1253_s23, %s1249_s8  ;;  %p1257_p10 = scmp.lt.u32.totalorder %s1249_s8, %s1575_s27 }
 0x181   : > { %p1251_p6 = pnand %p1250_p2, %p1648_p11 }
 0x182   : > { %p1256_p5 = por %p1255_p8, %p1254_p4 }
 0x183   : > { %p1252_p12 = pneg %p1251_p6 }
 0x184   : > { %p1258_p1 = por %p1257_p10, %p1256_p5 }
 0x186   : > { %p1259_p0 = pnand %p1258_p1, %p1252_p12 }
 0x188   : > { %1262 = shalt.err (!%p1259_p0)
}
 0x189   : > { %1053 = dma.vmem_to_hbm [thread:$0]  (%p1648_p11), %s1577_s6, 64, %s1575_s27, %s795_s7  }
 0x18a PF: > { %s820_s18 = sand.u32 1, %s1301_s12   ;;  %p1649_p9 = scmp.ne.s32.totalorder %s1638_s25, 0 }
 0x18b   : > { %p1650_p3 = scmp.ge.s32.totalorder %s1321_s17, 2  ;;  %s821_s22 = scalar_lea.sflag [#allocation5], %s820_s18 }
 0x18d   : > { %p1064_p7 = pnand %p1650_p3, %p1649_p9 }
 0x18f   : > { %1296 = dma.done.wait (!%p1064_p7), %s821_s22, 64  }
 0x190   : > { %1298 = vsyncadd (!%p1064_p7), %s821_s22, 4294967232  ;;  %s20_s17 = sadd.s32 1, %s1321_s17   ;;  %s1651_s12 = smov %s1305_s13 }
 0x191   : > { %p17_p13 = scmp.ge.s32.totalorder %s20_s17, 4   ;;  %s1652_s13 = smov %s1309_s14 }
 0x192   : > { %s1653_s14 = smov %s1468_s28  ;;  %s1654_s15 = smov %s1317_s16 }
 0x193   : > { %s1655_s16 = smov %s1657_s4  ;;  %19 = sbr.rel (!%p17_p13) target bundleno = 7 (0x7), region = 94 }
 0x19a   :  { %826 = vsyncpa [#allocation4], 1 }
 0x19b   :  { %828 = vsyncpa [#allocation4 + $0x1], 1 }
 0x19c   :  { %829 = vsyncpa [#allocation7], 1 }
 0x19d   :  { %831 = vsyncpa [#allocation7 + $0x1], 1 }
 0x19e   :  { %832 = vsyncpa [#allocation5], 1 }
 0x19f   :  { %834 = vsyncpa [#allocation5 + $0x1], 1 }

</bundles_post_ra>
